<compile_context>
chip_gen: v6e
topology: v6e:2x2x1
jax: 0.10.0
libtpu: 0.0.40
codegen_flags: <defaults>
</compile_context>

<pallas_src>
import jax
import jax.numpy as jnp
from jax.experimental import pallas as pl
from jax.experimental.pallas import tpu as pltpu

_LANE = 128     # vreg lane width (last dim)
_SUBLANE = 8    # vreg sublane count (second-to-last dim)


def _round_up(v, m):
    return ((v + m - 1) // m) * m


def two_layer_net_kernel(x_ref, w1_ref, b1_ref, w2_ref, b2_ref, o_ref):
    """One batch tile of y = relu(x @ W1 + b1) @ W2 + b2, entirely in VMEM."""
    # First linear (MXU) + bias + ReLU (clamp(min=0)) on the VPU.
    h = jnp.dot(x_ref[...], w1_ref[...], preferred_element_type=jnp.float32)
    h = jnp.maximum(h + b1_ref[...], 0.0)          # broadcast (1, H_p) over rows
    # Second linear (MXU) + bias.
    y = jnp.dot(h.astype(w2_ref.dtype), w2_ref[...],
                preferred_element_type=jnp.float32)
    o_ref[...] = (y + b2_ref[...]).astype(o_ref.dtype)


def two_layer_net(x, w1, b1, w2, b2, *, tile_n=256):
    """Forward pass of TwoLayerNet.

    x:  [N, D_in]   (row-major, same layout as the PyTorch Linear input)
    w1: [D_in, H]   (Linear1 weight, stored pre-transposed)
    b1: [H]
    w2: [H, D_out]  (Linear2 weight, stored pre-transposed)
    b2: [D_out]

    tile_n: batch-tile size. 256 is a conservative default that fits the
    scoped-VMEM defaults of v5e/v6e/v7x for small/medium H; for very large H,
    re-derive against the generation's VMEM (v7x: 64 MiB physical).
    """
    N, D_in = x.shape
    H = w1.shape[1]
    D_out = w2.shape[1]
    dtype = x.dtype
    itemsize = jnp.dtype(dtype).itemsize

    # ---- Pad lane dims to 128 and the batch dim to a multiple of the tile ----
    d_in_p = _round_up(D_in, _LANE)
    h_p = _round_up(H, _LANE)
    d_out_p = _round_up(D_out, _LANE)
    tile_n = min(tile_n, _round_up(N, _SUBLANE))      # tile never larger than batch
    n_p = _round_up(N, tile_n)

    # Zero-padding keeps every dot product unchanged on the valid slice:
    # padded K rows/cols of weights and padded bias entries are all zero.
    x_p = jnp.zeros((n_p, d_in_p), dtype).at[:N, :D_in].set(x)
    w1_p = jnp.zeros((d_in_p, h_p), w1.dtype).at[:D_in, :H].set(w1)
    b1_p = jnp.zeros((1, h_p), b1.dtype).at[0, :H].set(b1)
    w2_p = jnp.zeros((h_p, d_out_p), w2.dtype).at[:H, :D_out].set(w2)
    b2_p = jnp.zeros((1, d_out_p), b2.dtype).at[0, :D_out].set(b2)

    grid = (n_p // tile_n,)

    # ---- VMEM budget: resident weights + double-buffered I/O tiles + live f32 ----
    weight_bytes = (d_in_p * h_p + h_p + h_p * d_out_p + d_out_p) * itemsize
    io_tile_bytes = 2 * tile_n * (d_in_p + d_out_p) * itemsize   # double-buffered x/out
    live_bytes = tile_n * (h_p + d_out_p) * 4                    # f32 intermediates
    needed = weight_bytes + io_tile_bytes + live_bytes
    vmem_limit = int(min(max(2 * needed, 32 * 1024 * 1024), 100 * 1024 * 1024))

    cost = pl.CostEstimate(
        flops=2 * n_p * (d_in_p * h_p + h_p * d_out_p),
        transcendentals=0,
        bytes_accessed=(x_p.size + w1_p.size + b1_p.size + w2_p.size
                        + b2_p.size + n_p * d_out_p) * itemsize,
    )

    out_p = pl.pallas_call(
        two_layer_net_kernel,
        out_shape=jax.ShapeDtypeStruct((n_p, d_out_p), dtype),
        grid_spec=pltpu.PrefetchScalarGridSpec(
            num_scalar_prefetch=0,
            grid=grid,
            in_specs=[
                pl.BlockSpec((tile_n, d_in_p), lambda i: (i, 0)),   # x: streamed per tile
                pl.BlockSpec((d_in_p, h_p), lambda i: (0, 0)),      # W1: VMEM-resident
                pl.BlockSpec((1, h_p), lambda i: (0, 0)),           # b1: VMEM-resident
                pl.BlockSpec((h_p, d_out_p), lambda i: (0, 0)),     # W2: VMEM-resident
                pl.BlockSpec((1, d_out_p), lambda i: (0, 0)),       # b2: VMEM-resident
            ],
            out_specs=pl.BlockSpec((tile_n, d_out_p), lambda i: (i, 0)),
        ),
        compiler_params=pltpu.CompilerParams(
            dimension_semantics=("parallel",),   # shard batch tiles across TCs on v7x
            vmem_limit_bytes=vmem_limit,
        ),
        cost_estimate=cost,
    )(x_p, w1_p, b1_p, w2_p, b2_p)

    # Slice off the zero padding.
    return out_p[:N, :D_out]


if __name__ == "__main__":
    # Small shapes consistent with the module: N x D_in -> H -> D_out.
    # N=256 with tile_n=128 exercises the multi-tile pipelined path.
    N, D_in, H, D_out = 256, 32, 64, 16

    key = jax.random.PRNGKey(0)
    kx, kw1, kb1, kw2, kb2 = jax.random.split(key, 5)

    x = jax.random.normal(kx, (N, D_in), dtype=jnp.float32)

    # Deterministic PyTorch-Linear-style init: U(-1/sqrt(fan_in), 1/sqrt(fan_in)).
    bound1 = 1.0 / jnp.sqrt(jnp.float32(D_in))
    bound2 = 1.0 / jnp.sqrt(jnp.float32(H))
    # Weights stored pre-transposed: [D_in, H] and [H, D_out].
    w1 = jax.random.uniform(kw1, (D_in, H), jnp.float32, -bound1, bound1)
    b1 = jax.random.uniform(kb1, (H,), jnp.float32, -bound1, bound1)
    w2 = jax.random.uniform(kw2, (H, D_out), jnp.float32, -bound2, bound2)
    b2 = jax.random.uniform(kb2, (D_out,), jnp.float32, -bound2, bound2)

    y = two_layer_net(x, w1, b1, w2, b2, tile_n=128)
    jax.block_until_ready(y)

    # Pure-JAX reference check of forward semantics.
    y_ref = jnp.maximum(x @ w1 + b1, 0.0) @ w2 + b2
    assert y.shape == (N, D_out)
    assert jnp.allclose(y, y_ref, atol=2e-5, rtol=2e-5)

    print("KERNEL_OK")
</pallas_src>

<mosaic_0001>
module attributes {stable_mosaic.version = 11 : i64} {
  func.func @two_layer_net_kernel(%arg0: i32, %arg1: memref<128x128xf32, #tpu.memory_space<vmem>>, %arg2: memref<128x128xf32, #tpu.memory_space<vmem>>, %arg3: memref<1x128xf32, #tpu.memory_space<vmem>>, %arg4: memref<128x128xf32, #tpu.memory_space<vmem>>, %arg5: memref<1x128xf32, #tpu.memory_space<vmem>>, %arg6: memref<128x128xf32, #tpu.memory_space<vmem>>) attributes {dimension_semantics = [#tpu.dimension_semantics<parallel>], iteration_bounds = array<i64: 2>, scalar_prefetch = 0 : i64, scratch_operands = 0 : i64, tpu.core_type = #tpu.core_type<tc>, window_params = [{transform_indices = @transform_0, window_bounds = array<i64: 128, 128>}, {pipeline_mode = #tpu.pipeline_mode<synchronous>, transform_indices = @transform_1, window_bounds = array<i64: 128, 128>}, {pipeline_mode = #tpu.pipeline_mode<synchronous>, transform_indices = @transform_2, window_bounds = array<i64: 1, 128>}, {pipeline_mode = #tpu.pipeline_mode<synchronous>, transform_indices = @transform_3, window_bounds = array<i64: 128, 128>}, {pipeline_mode = #tpu.pipeline_mode<synchronous>, transform_indices = @transform_4, window_bounds = array<i64: 1, 128>}, {transform_indices = @transform_5, window_bounds = array<i64: 128, 128>}]} {
    %c0 = arith.constant 0 : index
    %c0_0 = arith.constant 0 : index
    %0 = vector.load %arg1[%c0, %c0_0] : memref<128x128xf32, #tpu.memory_space<vmem>>, vector<128x128xf32>
    %c0_1 = arith.constant 0 : index
    %c0_2 = arith.constant 0 : index
    %1 = vector.load %arg2[%c0_1, %c0_2] : memref<128x128xf32, #tpu.memory_space<vmem>>, vector<128x128xf32>
    %cst = arith.constant dense<0.000000e+00> : vector<128x128xf32>
    %2 = tpu.matmul %0, %1, %cst {dimension_numbers = #tpu.dot_dimension_numbers<[1], [0], [0], [1], [0, 0, 1, 1], [], []>} : vector<128x128xf32>, vector<128x128xf32>, vector<128x128xf32> -> vector<128x128xf32>
    %c0_3 = arith.constant 0 : index
    %c0_4 = arith.constant 0 : index
    %3 = vector.load %arg3[%c0_3, %c0_4] : memref<1x128xf32, #tpu.memory_space<vmem>>, vector<1x128xf32>
    %4 = vector.broadcast %3 : vector<1x128xf32> to vector<128x128xf32>
    %5 = arith.addf %2, %4 : vector<128x128xf32>
    %cst_5 = arith.constant 0.000000e+00 : f32
    %6 = vector.broadcast %cst_5 : f32 to vector<128x128xf32>
    %7 = arith.maximumf %5, %6 : vector<128x128xf32>
    %c0_6 = arith.constant 0 : index
    %c0_7 = arith.constant 0 : index
    %8 = vector.load %arg4[%c0_6, %c0_7] : memref<128x128xf32, #tpu.memory_space<vmem>>, vector<128x128xf32>
    %cst_8 = arith.constant dense<0.000000e+00> : vector<128x128xf32>
    %9 = tpu.matmul %7, %8, %cst_8 {dimension_numbers = #tpu.dot_dimension_numbers<[1], [0], [0], [1], [0, 0, 1, 1], [], []>} : vector<128x128xf32>, vector<128x128xf32>, vector<128x128xf32> -> vector<128x128xf32>
    %c0_9 = arith.constant 0 : index
    %c0_10 = arith.constant 0 : index
    %10 = vector.load %arg5[%c0_9, %c0_10] : memref<1x128xf32, #tpu.memory_space<vmem>>, vector<1x128xf32>
    %11 = vector.broadcast %10 : vector<1x128xf32> to vector<128x128xf32>
    %12 = arith.addf %9, %11 : vector<128x128xf32>
    %c0_11 = arith.constant 0 : index
    %c0_12 = arith.constant 0 : index
    %13 = vector.load %arg6[%c0_11, %c0_12] : memref<128x128xf32, #tpu.memory_space<vmem>>, vector<128x128xf32>
    tpu.vector_store %arg6[%c0_11, %c0_12], %12 {strides = array<i32>} : memref<128x128xf32, #tpu.memory_space<vmem>>, vector<128x128xf32>,
    return
  }
  func.func @transform_0(%arg0: i32) -> (i32, i32) {
    %c0_i32 = arith.constant 0 : i32
    %c0_i32_0 = arith.constant 0 : i32
    return %arg0, %c0_i32 : i32, i32
  }
  func.func @transform_1(%arg0: i32) -> (i32, i32) {
    %c0_i32 = arith.constant 0 : i32
    %c0_i32_0 = arith.constant 0 : i32
    %c0_i32_1 = arith.constant 0 : i32
    return %c0_i32, %c0_i32_0 : i32, i32
  }
  func.func @transform_2(%arg0: i32) -> (i32, i32) {
    %c0_i32 = arith.constant 0 : i32
    %c0_i32_0 = arith.constant 0 : i32
    %c0_i32_1 = arith.constant 0 : i32
    return %c0_i32, %c0_i32_0 : i32, i32
  }
  func.func @transform_3(%arg0: i32) -> (i32, i32) {
    %c0_i32 = arith.constant 0 : i32
    %c0_i32_0 = arith.constant 0 : i32
    %c0_i32_1 = arith.constant 0 : i32
    return %c0_i32, %c0_i32_0 : i32, i32
  }
  func.func @transform_4(%arg0: i32) -> (i32, i32) {
    %c0_i32 = arith.constant 0 : i32
    %c0_i32_0 = arith.constant 0 : i32
    %c0_i32_1 = arith.constant 0 : i32
    return %c0_i32, %c0_i32_0 : i32, i32
  }
  func.func @transform_5(%arg0: i32) -> (i32, i32) {
    %c0_i32 = arith.constant 0 : i32
    %c0_i32_0 = arith.constant 0 : i32
    return %arg0, %c0_i32 : i32, i32
  }
}

</mosaic_0001>

<bundles_post_ra>
// kernel: tpu_custom_call.1
= control target key start
LH: loop header
LB: loop body
LE: loop exit
PB: predicated region body
PF: predicated region fallthrough
CT: control target
= control target key end

     0   :  { %10 = vsyncpa [#allocation3], 0  ;;  %s1465_s0 = inlined_call_operand.hbm [shape: f32[256,128], index: 0, kind: input, shape index: {}]   ;;  %s1466_s1 = inlined_call_operand.hbm [shape: f32[128,128], index: 1, kind: input, shape index: {}]   ;;  %s1467_s2 = inlined_call_operand.vmem [shape: f32[1,128], index: 2, kind: input, shape index: {}]   ;;  %s1468_s3 = inlined_call_operand.hbm [shape: f32[128,128], index: 3, kind: input, shape index: {}]   ;;  %s1469_s4 = inlined_call_operand.vmem [shape: f32[1,128], index: 4, kind: input, shape index: {}]   ;;  %s1470_s5 = inlined_call_operand.hbm [shape: f32[256,128], index: 5, kind: output, shape index: {}]  }
   0x1   :  { %12 = vsyncpa [#allocation3 + $0x1], 0 }
   0x2   :  { %13 = vsyncpa [#allocation6], 0 }
   0x3   :  { %14 = vsyncpa [#allocation4], 0 }
   0x4   :  { %16 = vsyncpa [#allocation4 + $0x1], 0  ;;  %s1221_s18 = smov 0   ;;  %s1223_s19 = smov 0  }
   0x5   :  { %s1225_s20 = smov 0   ;;  %s1227_s21 = smov 0  }
   0x6 LB: > { %s1242_s22 = sadd.s32 4294967295, %s1181_s21   ;;  %s764_s23 = sadd.s32 4294967294, %s1181_s21   ;;  %s1181_s21 = sphi %s1227_s21, %s1493_s21   ;;  %s1177_s20 = sphi %s1225_s20, %s1492_s20   ;;  %s1173_s19 = sphi %s1223_s19, %s1491_s19   ;;  %s1169_s18 = sphi %s1221_s18, %s1490_s18  }
   0x7   : > { %p42_p0 = scmp.ne.s32.totalorder %s1173_s19, %s1169_s18  ;;  %p1471_p1 = scmp.eq.s32.totalorder %s1242_s22, 0 }
   0x8   : > { %p150_p2 = scmp.eq.s32.totalorder %s1242_s22, 1  ;;  %p156_p3 = scmp.eq.s32.totalorder %s764_s23, 1 }
   0x9   : > { %p1251_p4 = por %p1471_p1, %p42_p0  ;;  %p765_p5 = scmp.ge.s32.totalorder %s1181_s21, 1 }
   0xa   : > { %p1256_p6 = por %p156_p3, %p42_p0  ;;  %p163_p7 = scmp.lt.s32.totalorder %s1181_s21, 3 }
   0xb   : > { %s1476_s24 = scalar_select %p1251_p4, 1, 0 }
   0xc   : > { %s1477_s25 = scalar_select %p1256_p6, 1, 0 }
   0xd   : > { %p1261_p8 = pnand %p765_p5, %p163_p7  ;;  %s1183_s27 = smov [#allocation5]  }
   0xe   : > { %s175_s28 = sshll.u32 %s1183_s27, 4  ;;  %s1184_s30 = smov [#allocation7]   ;;  %s176_s28 = int_to_ptr.vmem [resolvable:$true] %s175_s28 }
   0xf   : > { %s1478_s26 = scalar_select %p1261_p8, 1, 0 }
  0x10   : > { %p974_p9 = pneg %p1261_p8  ;;  %s191_s6 = sshll.u32 %s1184_s30, 4  ;;  %s192_s6 = int_to_ptr.vmem [resolvable:$true] %s191_s6 }
  0x11   : > { %s1044_s7 = scalar_lea.vmem %s176_s28, 2048  ;;  %p1052_p5 = scmp.lt.s32.totalorder %s176_s28, %s176_s28 }
  0x12   : > { %p1270_p11 = pnand %p974_p9, %p1471_p1  ;;  %p1045_p13 = scmp.ne.s32.totalorder %s176_s28, %s1044_s7 }
  0x13   : > { %p1053_p7 = scmp.lt.s32.totalorder %s1044_s7, %s1044_s7 }
  0x14   : > { %p1035_p12 = pneg %p1270_p11 }
  0x15   : > { %p1054_p10 = por %p1053_p7, %p1052_p5 }
  0x16   : > { %p1047_p0 = pnand %p1045_p13, %p1035_p12 }
  0x18   : > { %p1048_p3 = pneg %p1047_p0 }
  0x1a   : > { %p1055_p9 = pnand %p1054_p10, %p1048_p3 }
  0x1c   : > { %1058 = shalt.err (!%p1055_p9)
}
  0x1d   : > { %s1472_s8 = smov 128   ;;  %s1186_s9 = smov 8  }
  0x1e   : > { %977 = dma.hbm_to_vmem [thread:$0]  (!%p1270_p11), %s1466_s1, 2048, %s176_s28, [#allocation6], %s1472_s8, %s1472_s8, %s1186_s9  }
  0x1f   : > { %s1070_s12 = scalar_lea.vmem %s192_s6, 2048  ;;  %p1078_p10 = scmp.lt.s32.totalorder %s192_s6, %s192_s6 }
  0x20   : > { %p1071_p13 = scmp.ne.s32.totalorder %s192_s6, %s1070_s12  ;;  %p1079_p3 = scmp.lt.s32.totalorder %s1070_s12, %s1070_s12 }
  0x22   : > { %p1073_p0 = pnand %p1071_p13, %p1035_p12  ;;  %p1080_p7 = por %p1079_p3, %p1078_p10 }
  0x24   : > { %p1074_p5 = pneg %p1073_p0 }
  0x26   : > { %p1081_p9 = pnand %p1080_p7, %p1074_p5 }
  0x28   : > { %1084 = shalt.err (!%p1081_p9)
}
  0x29   : > { %980 = dma.hbm_to_vmem [thread:$0]  (!%p1270_p11), %s1468_s3, 2048, %s192_s6, [#allocation6], %s1472_s8, %s1472_s8, %s1186_s9  }
  0x2a   : > { %s1299_s15 = sadd.s32 1, %s1181_s21   ;;  %s29_s16 = sadd.s32 1, %s1177_s20 }
  0x2b   : > { %s26_s17 = ssub.s32 %s1181_s21, %s1299_s15  ;;  %p36_p12 = scmp.ne.s32.totalorder %s1177_s20, %s1173_s19 }
  0x2c   : > { %p27_p13 = scmp.eq.s32.totalorder %s26_s17, 0  ;;  %p37_p0 = scmp.eq.s32.totalorder %s1181_s21, 0 }
  0x2d   : > { %p1309_p5 = por %p150_p2, %p36_p12  ;;  %p991_p10 = scmp.lt.s32.totalorder %s1181_s21, 2 }
  0x2e   : > { %s1315_s27 = scalar_select %p27_p13, %s1177_s20, %s29_s16  }
  0x2f   : > { %s1480_s23 = scalar_select %p1309_p5, 1, 0 }
  0x30   : > { %p38_p3 = por %p37_p0, %p36_p12  ;;  %s208_s28 = sand.u32 1, %s1177_s20  }
  0x31   : > { %s769_s29 = sshll.u32 %s208_s28, 7  ;;  %s784_s30 = sshll.u32 %s1181_s21, 11 }
  0x32   : > { %s1322_s10 = scalar_lea.hbm %s1465_s0, %s784_s30  ;;  %s212_s11 = scalar_lea.vmem [#allocation2], %s769_s29 }
  0x33   : > { %s219_s12 = sshll.u32 %s212_s11, 4  ;;  %p1326_p2 = pnand %p991_p10, %p38_p3  ;;  %s1324_s12 = int_to_ptr.vmem [resolvable:$true] %s219_s12 }
  0x34   : > { %s1330_s14 = scalar_lea.sflag [#allocation3], %s208_s28  ;;  %s1085_s16 = scalar_lea.hbm %s1322_s10, 2048 }
  0x35   : > { %p1086_p11 = scmp.ne.s32.totalorder %s1322_s10, %s1085_s16  ;;  %p1087_p7 = pneg %p1326_p2 }
  0x36   : > { %s1090_s29 = scalar_lea.hbm %s1465_s0, 4096  ;;  %p1091_p13 = scmp.lt.s32.totalorder %s1322_s10, %s1465_s0 }
  0x37   : > { %p1088_p9 = pnand %p1087_p7, %p1086_p11  ;;  %p1092_p0 = scmp.lt.s32.totalorder %s1090_s29, %s1085_s16 }
  0x39   : > { %p1089_p12 = pneg %p1088_p9  ;;  %p1093_p10 = por %p1092_p0, %p1091_p13 }
  0x3b   : > { %p1094_p3 = pnand %p1093_p10, %p1089_p12 }
  0x3d   : > { %1097 = shalt.err (!%p1094_p3)
}
  0x3e   : > { %s1098_s28 = scalar_lea.vmem %s1324_s12, 2048  ;;  %s1187_s11 = smov [#allocation2]  }
  0x3f   : > { %p1099_p1 = scmp.ne.s32.totalorder %s1324_s12, %s1098_s28  ;;  %s1103_s8 = sshll.u32 %s1187_s11, 4  ;;  %s1104_s8 = int_to_ptr.vmem [resolvable:$false] %s1103_s8 }
  0x40   : > { %s1105_s17 = scalar_lea.vmem %s1104_s8, 4096  ;;  %p1106_p9 = scmp.lt.s32.totalorder %s1324_s12, %s1104_s8 }
  0x41   : > { %p1101_p6 = pnand %p1099_p1, %p1087_p7  ;;  %p1107_p5 = scmp.lt.s32.totalorder %s1105_s17, %s1098_s28 }
  0x43   : > { %p1102_p11 = pneg %p1101_p6  ;;  %p1108_p4 = por %p1107_p5, %p1106_p9 }
  0x45   : > { %p1109_p8 = pnand %p1108_p4, %p1102_p11 }
  0x47   : > { %1112 = shalt.err (!%p1109_p8)
}
  0x48   : > { %s1482_s16 = smov 128   ;;  %p1483_p1 = scmp.ne.s32.totalorder %s1478_s26, 0 }
  0x49   : > { %984 = dma.hbm_to_vmem [thread:$0]  (!%p1326_p2), %s1322_s10, 2048, %s1324_s12, %s1330_s14, %s1482_s16, %s1482_s16, %s1186_s9  }
  0x4a   : > { %231 = sbr.rel (%p1483_p1) target bundleno = 555 (0x22b), region = 40  ;;  %s1357_s30 = sand.u32 (!%p1483_p1), 1, %s1173_s19  }
  0x4b   : > { %s773_s8 = sshll.u32 (!%p1483_p1), %s1357_s30, 7  ;;  %s234_s29 = scalar_lea.sflag (!%p1483_p1), [#allocation3], %s1357_s30 }
  0x4c   : > { %s1363_s13 = scalar_lea.vmem (!%p1483_p1), [#allocation2], %s773_s8  ;;  %p1484_p4 = scmp.ne.s32.totalorder (!%p1483_p1), %s1476_s24, 0 }
  0x4f   : > { %1156 = dma.done.wait (%p1484_p4), %s234_s29, 2048  }
  0x50   : > { %1158 = vsyncadd (%p1484_p4), %s234_s29, 4294965248  ;;  %p1485_p6 = scmp.eq.s32.totalorder %s1242_s22, 0 }
  0x52   : > { %1160 = dma.done.wait (%p1485_p6), [#allocation6], 4096   ;;  %p1486_p8 = pmov %p1485_p6 }
  0x53   : > { %v305_v0 = vld [vmem:[#allocation5 + $0x78] sm:$0xff]  ;;  %v304_v1 = vld [vmem:[#allocation5 + $0x70] sm:$0xff]  ;;  %v303_v2 = vld [vmem:[#allocation5 + $0x68] sm:$0xff]  ;;  %s1397_s12 = scalar_lea.vmem [#allocation8], %s773_s8  ;;  %s785_s14 = sshll.u32 %s1242_s22, 11 }
  0x54   : > { %1162 = vsyncadd (%p1486_p8), [#allocation6], 4294963200  ;;  %850 = vmatprep.subr.mxu0 %v305_v0  ;;  %v302_v3 = vld [vmem:[#allocation5 + $0x60] sm:$0xff]  ;;  %v301_v5 = vld [vmem:[#allocation5 + $0x58] sm:$0xff]  ;;  %s672_s6 = sshll.u32 %s1397_s12, 4  ;;  %s1418_s11 = scalar_lea.hbm %s1470_s5, %s785_s14  ;;  %s1420_s6 = int_to_ptr.vmem [resolvable:$true] %s672_s6 }
  0x55   : > { %851 = vmatpush3.msra.mxu0 %v305_v0  ;;  %v274_v4 = vld [vmem:[%s1363_s13] sm:$0xff]  ;;  %v300_v6 = vld [vmem:[#allocation5 + $0x50] sm:$0xff]  ;;  %v299_v7 = vld [vmem:[#allocation5 + $0x48] sm:$0xff]  ;;  %s659_s17 = scalar_lea.sflag [#allocation4], %s1357_s30  ;;  %s1113_s22 = scalar_lea.vmem %s1420_s6, 2048 }
  0x56   : > { %852 = vmatprep.subr.mxu0 %v304_v1  ;;  %882 = vmatprep.mubr.f32.mxu0 %v274_v4  ;;  %v489_v8 = vld [vmem:[#allocation7 + $0x78] sm:$0xff]  ;;  %v488_v9 = vld [vmem:[#allocation7 + $0x70] sm:$0xff]  ;;  %v298_v10 = vld [vmem:[#allocation5 + $0x40] sm:$0xff]  ;;  %p1114_p5 = scmp.ne.s32.totalorder %s1420_s6, %s1113_s22  ;;  %p1487_p2 = scmp.ne.s32.totalorder %s1480_s23, 0 }
  0x57   : > { %853 = vmatpush3.msra.mxu0 %v304_v1  ;;  %906 = vmatprep.subr.mxu1 %v489_v8  ;;  %v487_v11 = vld [vmem:[#allocation7 + $0x68] sm:$0xff]  ;;  %v297_v12 = vld [vmem:[#allocation5 + $0x38] sm:$0xff]  ;;  %v486_v13 = vld [vmem:[#allocation7 + $0x60] sm:$0xff]  ;;  %s1188_s16 = smov [#allocation8]  }
  0x58   : > { %854 = vmatprep.subr.mxu0 %v303_v2  ;;  %907 = vmatpush3.msra.mxu1 %v489_v8  ;;  %v296_v14 = vld [vmem:[#allocation5 + $0x30] sm:$0xff]  ;;  %v485_v15 = vld [vmem:[#allocation7 + $0x58] sm:$0xff]  ;;  %v295_v16 = vld [vmem:[#allocation5 + $0x28] sm:$0xff]  ;;  %p1115_p7 = pnand %p1114_p5, %p1487_p2  ;;  %s1117_s8 = sshll.u32 %s1188_s16, 4  ;;  %s1118_s8 = int_to_ptr.vmem [resolvable:$false] %s1117_s8 }
  0x59   : > { %855 = vmatpush3.msra.mxu0 %v303_v2  ;;  %908 = vmatprep.subr.mxu1 %v488_v9  ;;  %v484_v17 = vld [vmem:[#allocation7 + $0x50] sm:$0xff]  ;;  %v294_v18 = vld [vmem:[#allocation5 + $0x20] sm:$0xff]  ;;  %v483_v19 = vld [vmem:[#allocation7 + $0x48] sm:$0xff]  ;;  %s1119_s29 = scalar_lea.vmem %s1118_s8, 4096  ;;  %p1120_p13 = scmp.lt.s32.totalorder %s1420_s6, %s1118_s8 }
  0x5a   : > { %856 = vmatprep.subr.mxu0 %v302_v3  ;;  %909 = vmatpush3.msra.mxu1 %v488_v9  ;;  %v293_v20 = vld [vmem:[#allocation5 + $0x18] sm:$0xff]  ;;  %v482_v21 = vld [vmem:[#allocation7 + $0x40] sm:$0xff]  ;;  %v292_v22 = vld [vmem:[#allocation5 + $0x10] sm:$0xff]  ;;  %p1116_p12 = pneg %p1115_p7  ;;  %p1121_p0 = scmp.lt.s32.totalorder %s1119_s29, %s1113_s22 }
  0x5b   : > { %857 = vmatpush3.msra.mxu0 %v302_v3  ;;  %910 = vmatprep.subr.mxu1 %v487_v11  ;;  %v481_v23 = vld [vmem:[#allocation7 + $0x38] sm:$0xff]  ;;  %v291_v24 = vld [vmem:[#allocation5 + $0x8] sm:$0xff]  ;;  %v480_v25 = vld [vmem:[#allocation7 + $0x30] sm:$0xff] }
  0x5c   : > { %858 = vmatprep.subr.mxu0 %v301_v5  ;;  %911 = vmatpush3.msra.mxu1 %v487_v11  ;;  %v290_v26 = vld [vmem:[#allocation5] sm:$0xff]  ;;  %v479_v27 = vld [vmem:[#allocation7 + $0x28] sm:$0xff]  ;;  %v276_v30 = vld [vmem:[%s1363_s13 + $0x10] sm:$0xff]  ;;  %p1122_p10 = por %p1121_p0, %p1120_p13 }
  0x5d   : > { %859 = vmatpush3.msra.mxu0 %v301_v5  ;;  %912 = vmatprep.subr.mxu1 %v486_v13  ;;  %v275_v28 = vld [vmem:[%s1363_s13 + $0x8] sm:$0xff]  ;;  %v478_v29 = vld [vmem:[#allocation7 + $0x20] sm:$0xff]  ;;  %v277_v31 = vld [vmem:[%s1363_s13 + $0x18] sm:$0xff] }
  0x5e   : > { %860 = vmatprep.subr.mxu0 %v300_v6  ;;  %913 = vmatpush3.msra.mxu1 %v486_v13  ;;  %v278_v32 = vld [vmem:[%s1363_s13 + $0x20] sm:$0xff]  ;;  %v279_v33 = vld [vmem:[%s1363_s13 + $0x28] sm:$0xff]  ;;  %v280_v34 = vld [vmem:[%s1363_s13 + $0x30] sm:$0xff]  ;;  %p1123_p3 = pnand %p1122_p10, %p1116_p12 }
  0x5f   : > { %861 = vmatpush3.msra.mxu0 %v300_v6  ;;  %914 = vmatprep.subr.mxu1 %v485_v15  ;;  %v281_v35 = vld [vmem:[%s1363_s13 + $0x38] sm:$0xff]  ;;  %v282_v36 = vld [vmem:[%s1363_s13 + $0x40] sm:$0xff]  ;;  %v283_v37 = vld [vmem:[%s1363_s13 + $0x48] sm:$0xff] }
  0x60   : > { %862 = vmatprep.subr.mxu0 %v299_v7  ;;  %915 = vmatpush3.msra.mxu1 %v485_v15  ;;  %v284_v38 = vld [vmem:[%s1363_s13 + $0x50] sm:$0xff]  ;;  %v285_v39 = vld [vmem:[%s1363_s13 + $0x58] sm:$0xff]  ;;  %v286_v40 = vld [vmem:[%s1363_s13 + $0x60] sm:$0xff] }
  0x61   : > { %863 = vmatpush3.msra.mxu0 %v299_v7  ;;  %916 = vmatprep.subr.mxu1 %v484_v17  ;;  %v287_v41 = vld [vmem:[%s1363_s13 + $0x68] sm:$0xff]  ;;  %v288_v42 = vld [vmem:[%s1363_s13 + $0x70] sm:$0xff]  ;;  %v289_v43 = vld [vmem:[%s1363_s13 + $0x78] sm:$0xff] }
  0x62   : > { %864 = vmatprep.subr.mxu0 %v298_v10  ;;  %917 = vmatpush3.msra.mxu1 %v484_v17  ;;  %v477_v44 = vld [vmem:[#allocation7 + $0x18] sm:$0xff]  ;;  %v476_v45 = vld [vmem:[#allocation7 + $0x10] sm:$0xff]  ;;  %v475_v46 = vld [vmem:[#allocation7 + $0x8] sm:$0xff] }
  0x63   : > { %865 = vmatpush3.msra.mxu0 %v298_v10  ;;  %918 = vmatprep.subr.mxu1 %v483_v19  ;;  %v474_v47 = vld [vmem:[#allocation7] sm:$0xff] }
  0x64   : > { %866 = vmatprep.subr.mxu0 %v297_v12  ;;  %919 = vmatpush3.msra.mxu1 %v483_v19  ;;  %v777_v48 = vld [vmem:[%s1467_s2] ss:$0 sm:$0xff] }
  0x65   : > { %867 = vmatpush3.msra.mxu0 %v297_v12  ;;  %920 = vmatprep.subr.mxu1 %v482_v21 }
  0x66   : > { %868 = vmatprep.subr.mxu0 %v296_v14  ;;  %921 = vmatpush3.msra.mxu1 %v482_v21 }
  0x67   : > { %869 = vmatpush3.msra.mxu0 %v296_v14  ;;  %922 = vmatprep.subr.mxu1 %v481_v23 }
  0x68   : > { %870 = vmatprep.subr.mxu0 %v295_v16  ;;  %923 = vmatpush3.msra.mxu1 %v481_v23 }
  0x69   : > { %871 = vmatpush3.msra.mxu0 %v295_v16  ;;  %924 = vmatprep.subr.mxu1 %v480_v25 }
  0x6a   : > { %872 = vmatprep.subr.mxu0 %v294_v18  ;;  %925 = vmatpush3.msra.mxu1 %v480_v25 }
  0x6b   : > { %873 = vmatpush3.msra.mxu0 %v294_v18  ;;  %926 = vmatprep.subr.mxu1 %v479_v27 }
  0x6c   : > { %874 = vmatprep.subr.mxu0 %v293_v20  ;;  %927 = vmatpush3.msra.mxu1 %v479_v27 }
  0x6d   : > { %875 = vmatpush3.msra.mxu0 %v293_v20  ;;  %928 = vmatprep.subr.mxu1 %v478_v29 }
  0x6e   : > { %876 = vmatprep.subr.mxu0 %v292_v22  ;;  %929 = vmatpush3.msra.mxu1 %v478_v29 }
  0x6f   : > { %877 = vmatpush3.msra.mxu0 %v292_v22  ;;  %930 = vmatprep.subr.mxu1 %v477_v44 }
  0x70   : > { %878 = vmatprep.subr.mxu0 %v291_v24  ;;  %931 = vmatpush3.msra.mxu1 %v477_v44 }
  0x71   : > { %879 = vmatpush3.msra.mxu0 %v291_v24  ;;  %932 = vmatprep.subr.mxu1 %v476_v45 }
  0x72   : > { %880 = vmatprep.subr.mxu0 %v290_v26  ;;  %933 = vmatpush3.msra.mxu1 %v476_v45 }
  0x73   : > { %881 = vmatpush3.msra.mxu0 %v290_v26  ;;  %934 = vmatprep.subr.mxu1 %v475_v46 }
  0x74   : > { %883 = vmatmul.mubr.f32.vlgmr.msra.gmra.mxu0 %v275_v28  ;;  %935 = vmatpush3.msra.mxu1 %v475_v46 }
  0x75   : > { %885 = vmatprep.mubr.f32.mxu0 %v276_v30  ;;  %936 = vmatprep.subr.mxu1 %v474_v47 }
  0x76   : > { %937 = vmatpush3.msra.mxu1 %v474_v47 }
  0x78   : > { %886 = vmatmul.mubr.f32.gmra.mxu0 %v277_v31 }
  0x79   : > { %888 = vmatprep.mubr.f32.mxu0 %v278_v32 }
  0x7c   : > { %889 = vmatmul.mubr.f32.gmra.mxu0 %v279_v33  ;;  %v778_v33 = vld [vmem:[%s1469_s4] ss:$0 sm:$0xff] }
  0x7d   : > { %891 = vmatprep.mubr.f32.mxu0 %v280_v34 }
  0x80   : > { %892 = vmatmul.mubr.f32.gmra.mxu0 %v281_v35 }
  0x81   : > { %894 = vmatprep.mubr.f32.mxu0 %v282_v36 }
  0x84   : > { %895 = vmatmul.mubr.f32.gmra.mxu0 %v283_v37 }
  0x85   : > { %897 = vmatprep.mubr.f32.mxu0 %v284_v38 }
  0x88   : > { %898 = vmatmul.mubr.f32.gmra.mxu0 %v285_v39 }
  0x89   : > { %900 = vmatprep.mubr.f32.mxu0 %v286_v40 }
  0x8c   : > { %901 = vmatmul.mubr.f32.gmra.mxu0 %v287_v41 }
  0x8d   : > { %903 = vmatprep.mubr.f32.mxu0 %v288_v42 }
  0x90   : > { %904 = vmatmul.mubr.f32.gmra.mxu0 %v289_v43 }
 0x134   : > { %v884_v49 = vpop.f32.mrf.mxu0 }
 0x135   : > { %v385_v50 = vadd.f32 %v884_v49, %v777_v48 }
 0x136   : > { %v379_v51 = vpop.f32.mrf.mxu0 }
 0x137   : > { %v380_v52 = vadd.f32 %v777_v48, %v379_v51  ;;  %v459_v55 = vmax.f32 %v385_v50, 0.0 }
 0x138   : > { %v887_v53 = vpop.f32.mrf.mxu0 }
 0x139   : > { %v458_v54 = vmax.f32 %v380_v52, 0.0  ;;  %v395_v56 = vadd.f32 %v887_v53, %v777_v48 }
 0x13a   : > { %v389_v57 = vpop.f32.mrf.mxu0 }
 0x13b   : > { %v390_v58 = vadd.f32 %v777_v48, %v389_v57  ;;  %938 = vmatprep.mubr.f32.mxu1 %v458_v54  ;;  %v461_v61 = vmax.f32 %v395_v56, 0.0 }
 0x13c   : > { %v890_v59 = vpop.f32.mrf.mxu0  ;;  %939 = vmatmul.mubr.f32.vlgmr.msra.gmra.mxu1 %v459_v55 }
 0x13d   : > { %v460_v60 = vmax.f32 %v390_v58, 0.0  ;;  %v405_v62 = vadd.f32 %v890_v59, %v777_v48 }
 0x13e   : > { %v399_v63 = vpop.f32.mrf.mxu0 }
 0x13f   : > { %v400_v0 = vadd.f32 %v777_v48, %v399_v63  ;;  %941 = vmatprep.mubr.f32.mxu1 %v460_v60  ;;  %v463_v3 = vmax.f32 %v405_v62, 0.0 }
 0x140   : > { %v893_v1 = vpop.f32.mrf.mxu0  ;;  %942 = vmatmul.mubr.f32.gmra.mxu1 %v461_v61 }
 0x141   : > { %v462_v2 = vmax.f32 %v400_v0, 0.0  ;;  %v415_v4 = vadd.f32 %v893_v1, %v777_v48 }
 0x142   : > { %v409_v5 = vpop.f32.mrf.mxu0 }
 0x143   : > { %v410_v6 = vadd.f32 %v777_v48, %v409_v5  ;;  %944 = vmatprep.mubr.f32.mxu1 %v462_v2  ;;  %v465_v9 = vmax.f32 %v415_v4, 0.0 }
 0x144   : > { %v896_v7 = vpop.f32.mrf.mxu0  ;;  %945 = vmatmul.mubr.f32.gmra.mxu1 %v463_v3 }
 0x145   : > { %v464_v8 = vmax.f32 %v410_v6, 0.0  ;;  %v425_v10 = vadd.f32 %v896_v7, %v777_v48 }
 0x146   : > { %v419_v11 = vpop.f32.mrf.mxu0 }
 0x147   : > { %v420_v12 = vadd.f32 %v777_v48, %v419_v11  ;;  %947 = vmatprep.mubr.f32.mxu1 %v464_v8  ;;  %v467_v15 = vmax.f32 %v425_v10, 0.0 }
 0x148   : > { %v899_v13 = vpop.f32.mrf.mxu0  ;;  %948 = vmatmul.mubr.f32.gmra.mxu1 %v465_v9 }
 0x149   : > { %v466_v14 = vmax.f32 %v420_v12, 0.0  ;;  %v435_v16 = vadd.f32 %v899_v13, %v777_v48 }
 0x14a   : > { %v429_v17 = vpop.f32.mrf.mxu0 }
 0x14b   : > { %v430_v18 = vadd.f32 %v777_v48, %v429_v17  ;;  %950 = vmatprep.mubr.f32.mxu1 %v466_v14  ;;  %v469_v21 = vmax.f32 %v435_v16, 0.0 }
 0x14c   : > { %v902_v19 = vpop.f32.mrf.mxu0  ;;  %951 = vmatmul.mubr.f32.gmra.mxu1 %v467_v15 }
 0x14d   : > { %v468_v20 = vmax.f32 %v430_v18, 0.0  ;;  %v445_v22 = vadd.f32 %v902_v19, %v777_v48 }
 0x14e   : > { %v439_v23 = vpop.f32.mrf.mxu0 }
 0x14f   : > { %v440_v24 = vadd.f32 %v777_v48, %v439_v23  ;;  %953 = vmatprep.mubr.f32.mxu1 %v468_v20  ;;  %v471_v27 = vmax.f32 %v445_v22, 0.0 }
 0x150   : > { %v905_v25 = vpop.f32.mrf.mxu0  ;;  %954 = vmatmul.mubr.f32.gmra.mxu1 %v469_v21 }
 0x151   : > { %v470_v26 = vmax.f32 %v440_v24, 0.0  ;;  %v455_v28 = vadd.f32 %v905_v25, %v777_v48 }
 0x152   : > { %v449_v29 = vpop.f32.mrf.mxu0 }
 0x153   : > { %v450_v30 = vadd.f32 %v777_v48, %v449_v29  ;;  %956 = vmatprep.mubr.f32.mxu1 %v470_v26  ;;  %v473_v32 = vmax.f32 %v455_v28, 0.0 }
 0x154   : > { %957 = vmatmul.mubr.f32.gmra.mxu1 %v471_v27 }
 0x155   : > { %v472_v31 = vmax.f32 %v450_v30, 0.0 }
 0x157   : > { %959 = vmatprep.mubr.f32.mxu1 %v472_v31 }
 0x158   : > { %960 = vmatmul.mubr.f32.gmra.mxu1 %v473_v32 }
 0x1fc   : > { %v940_v34 = vpop.f32.mrf.mxu1 }
 0x1fd   : > { %v569_v35 = vadd.f32 %v940_v34, %v778_v33 }
 0x1fe   : > { %v563_v36 = vpop.f32.mrf.mxu1 }
 0x1ff   : > { %643 = vst [vmem:[%s1397_s12 + $0x8] sm:$0xff] %v569_v35  ;;  %v564_v37 = vadd.f32 %v778_v33, %v563_v36 }
 0x200   : > { %v943_v38 = vpop.f32.mrf.mxu1 }
 0x201   : > { %642 = vst [vmem:[%s1397_s12] sm:$0xff] %v564_v37  ;;  %v579_v39 = vadd.f32 %v943_v38, %v778_v33 }
 0x202   : > { %v573_v40 = vpop.f32.mrf.mxu1 }
 0x203   : > { %645 = vst [vmem:[%s1397_s12 + $0x18] sm:$0xff] %v579_v39  ;;  %v574_v41 = vadd.f32 %v778_v33, %v573_v40 }
 0x204   : > { %v946_v42 = vpop.f32.mrf.mxu1 }
 0x205   : > { %644 = vst [vmem:[%s1397_s12 + $0x10] sm:$0xff] %v574_v41  ;;  %v589_v43 = vadd.f32 %v946_v42, %v778_v33 }
 0x206   : > { %v583_v44 = vpop.f32.mrf.mxu1 }
 0x207   : > { %647 = vst [vmem:[%s1397_s12 + $0x28] sm:$0xff] %v589_v43  ;;  %v584_v45 = vadd.f32 %v778_v33, %v583_v44 }
 0x208   : > { %v949_v46 = vpop.f32.mrf.mxu1 }
 0x209   : > { %646 = vst [vmem:[%s1397_s12 + $0x20] sm:$0xff] %v584_v45  ;;  %v599_v47 = vadd.f32 %v949_v46, %v778_v33 }
 0x20a   : > { %v593_v48 = vpop.f32.mrf.mxu1 }
 0x20b   : > { %649 = vst [vmem:[%s1397_s12 + $0x38] sm:$0xff] %v599_v47  ;;  %v594_v49 = vadd.f32 %v778_v33, %v593_v48 }
 0x20c   : > { %v952_v50 = vpop.f32.mrf.mxu1 }
 0x20d   : > { %648 = vst [vmem:[%s1397_s12 + $0x30] sm:$0xff] %v594_v49  ;;  %v609_v51 = vadd.f32 %v952_v50, %v778_v33 }
 0x20e   : > { %v603_v52 = vpop.f32.mrf.mxu1 }
 0x20f   : > { %651 = vst [vmem:[%s1397_s12 + $0x48] sm:$0xff] %v609_v51  ;;  %v604_v53 = vadd.f32 %v778_v33, %v603_v52 }
 0x210   : > { %v955_v54 = vpop.f32.mrf.mxu1 }
 0x211   : > { %650 = vst [vmem:[%s1397_s12 + $0x40] sm:$0xff] %v604_v53  ;;  %v619_v55 = vadd.f32 %v955_v54, %v778_v33 }
 0x212   : > { %v613_v56 = vpop.f32.mrf.mxu1 }
 0x213   : > { %653 = vst [vmem:[%s1397_s12 + $0x58] sm:$0xff] %v619_v55  ;;  %v614_v57 = vadd.f32 %v778_v33, %v613_v56 }
 0x214   : > { %v958_v58 = vpop.f32.mrf.mxu1 }
 0x215   : > { %652 = vst [vmem:[%s1397_s12 + $0x50] sm:$0xff] %v614_v57  ;;  %v629_v59 = vadd.f32 %v958_v58, %v778_v33 }
 0x216   : > { %v623_v60 = vpop.f32.mrf.mxu1 }
 0x217   : > { %655 = vst [vmem:[%s1397_s12 + $0x68] sm:$0xff] %v629_v59  ;;  %v624_v61 = vadd.f32 %v778_v33, %v623_v60 }
 0x218   : > { %v961_v62 = vpop.f32.mrf.mxu1 }
 0x219   : > { %654 = vst [vmem:[%s1397_s12 + $0x60] sm:$0xff] %v624_v61  ;;  %v639_v63 = vadd.f32 %v961_v62, %v778_v33 }
 0x21a   : > { %v633_v0 = vpop.f32.mrf.mxu1 }
 0x21b   : > { %657 = vst [vmem:[%s1397_s12 + $0x78] sm:$0xff] %v639_v63  ;;  %v634_v1 = vadd.f32 %v778_v33, %v633_v0 }
 0x21d   : > { %656 = vst [vmem:[%s1397_s12 + $0x70] sm:$0xff] %v634_v1 }
 0x21e   : > { %1126 = shalt.err (!%p1123_p3)
}
 0x21f   : > { %s1127_s13 = scalar_lea.hbm %s1418_s11, 2048  ;;  %s1131_s9 = scalar_lea.hbm %s1470_s5, 4096 }
 0x220   : > { %p1128_p11 = scmp.ne.s32.totalorder %s1418_s11, %s1127_s13  ;;  %p1132_p4 = scmp.lt.s32.totalorder %s1418_s11, %s1470_s5 }
 0x221   : > { %p1133_p6 = scmp.lt.s32.totalorder %s1131_s9, %s1127_s13 }
 0x222   : > { %p1129_p9 = pnand %p1128_p11, %p1487_p2 }
 0x223   : > { %p1134_p8 = por %p1133_p6, %p1132_p4 }
 0x224   : > { %p1130_p1 = pneg %p1129_p9 }
 0x226   : > { %p1135_p5 = pnand %p1134_p8, %p1130_p1 }
 0x228   : > { %1138 = shalt.err (!%p1135_p5)
}
 0x229   : > { %s1189_s14 = smov 128   ;;  %s1190_s7 = smov 8  }
 0x22a   : > { %972 = dma.vmem_to_hbm [thread:$0]  (%p1487_p2), %s1420_s6, 2048, %s1418_s11, %s659_s17, %s1189_s14, %s1189_s14, %s1190_s7  }
 0x22b PF: > { %s687_s28 = sand.u32 1, %s1169_s18   ;;  %p1488_p7 = scmp.ne.s32.totalorder %s1477_s25, 0 }
 0x22c   : > { %p1489_p12 = scmp.ge.s32.totalorder %s1181_s21, 2  ;;  %s688_s22 = scalar_lea.sflag [#allocation4], %s687_s28 }
 0x22e   : > { %p986_p13 = pnand %p1489_p12, %p1488_p7 }
 0x230   : > { %p987_p0 = pneg %p986_p13 }
 0x232   : > { %1164 = dma.done.wait (%p987_p0), %s688_s22, 2048  }
 0x233   : > { %1166 = vsyncadd (%p987_p0), %s688_s22, 4294965248  ;;  %p19_p10 = scmp.ge.s32.totalorder %s1299_s15, 4   ;;  %s1490_s18 = smov %s1173_s19 }
 0x234   : > { %s1491_s19 = smov %s1177_s20  ;;  %s1492_s20 = smov %s1315_s27 }
 0x235   : > { %s1493_s21 = smov %s1299_s15  ;;  %21 = sbr.rel (!%p19_p10) target bundleno = 6 (0x6), region = 93 }
 0x23a   :  { %693 = vsyncpa [#allocation3], 1 }
 0x23b   :  { %695 = vsyncpa [#allocation3 + $0x1], 1 }
 0x23c   :  { %696 = vsyncpa [#allocation6], 1 }
 0x23d   :  { %697 = vsyncpa [#allocation4], 1 }
 0x23e   :  { %699 = vsyncpa [#allocation4 + $0x1], 1 }

</bundles_post_ra>
